<compile_context>
chip_gen: v6e
topology: v6e:2x2x1
jax: 0.10.0
libtpu: 0.0.40
codegen_flags: <defaults>
</compile_context>

<pallas_src>
import jax
import jax.numpy as jnp
from jax.experimental import pallas as pl
from jax.experimental.pallas import tpu as pltpu


def conv_silu_kernel(w_ref, p_ref, o_ref):
    # w_ref: (Cout, K) bf16   p_ref: (1, K, ts) bf16   o_ref: (1, Cout, ts) f32
    acc = jnp.dot(w_ref[...], p_ref[0], preferred_element_type=jnp.float32)
    # SiLU: x * sigmoid(x), computed on the f32 accumulator.
    o_ref[0] = (acc * jax.nn.sigmoid(acc)).astype(o_ref.dtype)


def downsample_forward(x, weight, downsample=2):
    """x: (N, C, H, W).  weight: (Cout, C, k, k) with k == downsample.
    Returns silu(conv2d(x, weight, stride=k, bias=None)) in NCHW."""
    k = downsample
    N, C, H, W = x.shape
    Cout = weight.shape[0]
    Ho, Wo = (H - k) // k + 1, (W - k) // k + 1   # == H//k, W//k (PyTorch VALID conv)
    S = Ho * Wo
    K = C * k * k

    # Crop remainder rows/cols (matches PyTorch stride-k conv; no-op when H,W % k == 0).
    x = x[:, :, : Ho * k, : Wo * k]

    # bf16 storage / MXU inputs, f32 accumulation in-kernel.
    xb = x.astype(jnp.bfloat16)
    wb = weight.astype(jnp.bfloat16)

    # Single input rearrange (one HBM pass over bf16 data):
    #   P[n, ci*k*k + dh*k + dw, ho*Wo + wo] = x[n, ci, k*ho + dh, k*wo + dw]
    # TODO(synk): fold this rearrange into the kernel (manual strided DMA of the
    # k*k shifted planes) to hit minimum HBM traffic.
    p = (xb.reshape(N, C, Ho, k, Wo, k)
           .transpose(0, 1, 3, 5, 2, 4)
           .reshape(N, K, S))

    # weight (Cout, Cin, k, k) -> (Cout, Cin*k*k), matching P's K ordering.
    w2 = wb.reshape(Cout, K)

    # Spatial tile: one lane-dense tile per image when small, else 512 columns.
    ts = S if S <= 2048 else 512
    n_s = pl.cdiv(S, ts)

    out_itemsize = jnp.dtype(x.dtype).itemsize
    vmem_need = (2 * K * ts * 2                      # double-buffered patch blocks (bf16)
                 + 2 * Cout * ts * out_itemsize      # double-buffered output blocks
                 + 2 * Cout * K * 2)                 # resident weight (conservative x2)
    vmem_limit = int(min(48 * 1024 * 1024, max(16 * 1024 * 1024, 2 * vmem_need)))

    cost = pl.CostEstimate(
        flops=2 * N * Cout * K * S,
        transcendentals=N * Cout * S,
        bytes_accessed=N * K * S * 2 + Cout * K * 2 + N * Cout * S * out_itemsize,
    )

    # TODO(synk): for very large dim (Cout*K weight approaching the v7x 64 MiB
    # VMEM budget), add a Cout grid axis and tile the weight as well.
    out_flat = pl.pallas_call(
        conv_silu_kernel,
        out_shape=jax.ShapeDtypeStruct((N, Cout, S), x.dtype),
        grid_spec=pltpu.PrefetchScalarGridSpec(
            num_scalar_prefetch=0,
            grid=(N, n_s),
            in_specs=[
                pl.BlockSpec((Cout, K), lambda n, s: (0, 0)),      # weight, resident
                pl.BlockSpec((1, K, ts), lambda n, s: (n, 0, s)),  # patch columns
            ],
            out_specs=pl.BlockSpec((1, Cout, ts), lambda n, s: (n, 0, s)),
        ),
        compiler_params=pltpu.CompilerParams(
            dimension_semantics=("parallel", "parallel"),
            vmem_limit_bytes=vmem_limit,
        ),
        cost_estimate=cost,
    )(w2, p)

    # Free reshape: (N, Cout, Ho*Wo) -> (N, Cout, Ho, Wo)  (already NCHW).
    return out_flat.reshape(N, Cout, Ho, Wo)


def reference_forward(x, weight, downsample=2):
    y = jax.lax.conv_general_dilated(
        x, weight,
        window_strides=(downsample, downsample),
        padding="VALID",
        dimension_numbers=("NCHW", "OIHW", "NCHW"),
    )
    return y * jax.nn.sigmoid(y)


if __name__ == "__main__":
    key = jax.random.PRNGKey(0)
    kx, kw = jax.random.split(key)

    N, dim, H, W = 2, 4, 16, 16
    downsample = 2

    x = jax.random.normal(kx, (N, dim, H, W), dtype=jnp.float32)
    # Deterministic synthetic init for Conv2d(dim, dim, 2, 2, bias=False) weight.
    fan_in = dim * downsample * downsample
    weight = jax.random.uniform(
        kw, (dim, dim, downsample, downsample), dtype=jnp.float32,
        minval=-1.0, maxval=1.0) / jnp.sqrt(fan_in)

    out = downsample_forward(x, weight, downsample)
    out = jax.block_until_ready(out)

    # Reference computed on the same bf16-rounded operands the kernel consumes
    # (the kernel accumulates in f32, so this comparison stays tight).
    x_q = x.astype(jnp.bfloat16).astype(jnp.float32)
    w_q = weight.astype(jnp.bfloat16).astype(jnp.float32)
    ref = reference_forward(x_q, w_q, downsample)

    assert out.shape == (N, dim, H // 2, W // 2)
    assert jnp.allclose(out, ref, atol=1e-3, rtol=1e-3), "mismatch vs reference conv"

    # TODO(synk): space=3 (Conv3d with kernel/stride (1,2,2)) maps onto the same
    # patch matmul by folding depth into the batch dim; only the 2D path is wired.
    print("KERNEL_OK")
</pallas_src>

<mosaic_0001>
module attributes {stable_mosaic.version = 11 : i64} {
  func.func @conv_silu_kernel(%arg0: i32, %arg1: i32, %arg2: memref<4x16xbf16, #tpu.memory_space<vmem>>, %arg3: memref<1x16x64xbf16, #tpu.memory_space<vmem>>, %arg4: memref<1x4x64xf32, #tpu.memory_space<vmem>>) attributes {dimension_semantics = [#tpu.dimension_semantics<parallel>, #tpu.dimension_semantics<parallel>], iteration_bounds = array<i64: 2, 1>, scalar_prefetch = 0 : i64, scratch_operands = 0 : i64, tpu.core_type = #tpu.core_type<tc>, window_params = [{pipeline_mode = #tpu.pipeline_mode<synchronous>, transform_indices = @transform_0, window_bounds = array<i64: 4, 16>}, {transform_indices = @transform_1, window_bounds = array<i64: 1, 16, 64>}, {transform_indices = @transform_2, window_bounds = array<i64: 1, 4, 64>}]} {
    %c0 = arith.constant 0 : index
    %c0_0 = arith.constant 0 : index
    %0 = vector.load %arg2[%c0, %c0_0] : memref<4x16xbf16, #tpu.memory_space<vmem>>, vector<4x16xbf16>
    %c0_1 = arith.constant 0 : index
    %c0_2 = arith.constant 0 : index
    %c0_3 = arith.constant 0 : index
    %1 = vector.load %arg3[%c0_1, %c0_2, %c0_3] : memref<1x16x64xbf16, #tpu.memory_space<vmem>>, vector<1x16x64xbf16>
    %2 = vector.shape_cast %1 : vector<1x16x64xbf16> to vector<16x64xbf16>
    %cst = arith.constant dense<0.000000e+00> : vector<4x64xf32>
    %3 = tpu.matmul %0, %2, %cst {dimension_numbers = #tpu.dot_dimension_numbers<[1], [0], [0], [1], [0, 0, 1, 1], [], []>} : vector<4x16xbf16>, vector<16x64xbf16>, vector<4x64xf32> -> vector<4x64xf32>
    %4 = arith.negf %3 : vector<4x64xf32>
    %5 = math.exp %4 : vector<4x64xf32>
    %cst_4 = arith.constant 1.000000e+00 : f32
    %6 = vector.broadcast %cst_4 : f32 to vector<4x64xf32>
    %7 = arith.addf %6, %5 : vector<4x64xf32>
    %8 = arith.divf %6, %7 : vector<4x64xf32>
    %9 = arith.mulf %3, %8 : vector<4x64xf32>
    %c0_5 = arith.constant 0 : index
    %c0_6 = arith.constant 0 : index
    %c0_7 = arith.constant 0 : index
    %10 = vector.load %arg4[%c0_5, %c0_6, %c0_7] : memref<1x4x64xf32, #tpu.memory_space<vmem>>, vector<1x4x64xf32>
    %11 = vector.shape_cast %10 : vector<1x4x64xf32> to vector<4x64xf32>
    %12 = vector.shape_cast %9 : vector<4x64xf32> to vector<1x4x64xf32>
    tpu.vector_store %arg4[%c0_5, %c0_6, %c0_7], %12 {strides = array<i32>} : memref<1x4x64xf32, #tpu.memory_space<vmem>>, vector<1x4x64xf32>,
    return
  }
  func.func @transform_0(%arg0: i32, %arg1: i32) -> (i32, i32) {
    %c0_i32 = arith.constant 0 : i32
    %c0_i32_0 = arith.constant 0 : i32
    %c0_i32_1 = arith.constant 0 : i32
    return %c0_i32, %c0_i32_0 : i32, i32
  }
  func.func @transform_1(%arg0: i32, %arg1: i32) -> (i32, i32, i32) {
    %c0_i32 = arith.constant 0 : i32
    %c0_i32_0 = arith.constant 0 : i32
    return %arg0, %c0_i32, %arg1 : i32, i32, i32
  }
  func.func @transform_2(%arg0: i32, %arg1: i32) -> (i32, i32, i32) {
    %c0_i32 = arith.constant 0 : i32
    %c0_i32_0 = arith.constant 0 : i32
    return %arg0, %c0_i32, %arg1 : i32, i32, i32
  }
}

</mosaic_0001>

<bundles_post_ra>
// kernel: tpu_custom_call.1
= control target key start
LH: loop header
LB: loop body
LE: loop exit
PB: predicated region body
PF: predicated region fallthrough
CT: control target
= control target key end

     0   :  { %7 = vsyncpa [#allocation3], 0  ;;  %s799_s0 = inlined_call_operand.hbm [shape: bf16[4,16], index: 0, kind: input, shape index: {}]   ;;  %s800_s1 = inlined_call_operand.hbm [shape: bf16[2,16,64], index: 1, kind: input, shape index: {}]   ;;  %s801_s2 = inlined_call_operand.hbm [shape: f32[2,4,64], index: 2, kind: output, shape index: {}]  }
   0x1   :  { %8 = vsyncpa [#allocation6], 0 }
   0x2   :  { %10 = vsyncpa [#allocation6 + $0x1], 0 }
   0x3   :  { %11 = vsyncpa [#allocation4], 0 }
   0x4   :  { %13 = vsyncpa [#allocation4 + $0x1], 0  ;;  %s635_s9 = smov 0   ;;  %s637_s10 = smov 0  }
   0x5   :  { %s639_s11 = smov 0   ;;  %s641_s12 = smov 0  }
   0x6   :  { %s643_s13 = smov 0   ;;  %s645_s14 = smov 0  }
   0x7 LB: > { %s363_s15 = sadd.s32 4294967295, %s611_s14   ;;  %s364_s16 = sadd.s32 4294967294, %s611_s14   ;;  %s611_s14 = sphi %s645_s14, %s19_s14   ;;  %s607_s13 = sphi %s643_s13, %s820_s13   ;;  %s603_s12 = sphi %s641_s12, %s819_s12   ;;  %s599_s11 = sphi %s639_s11, %s818_s11   ;;  %s595_s10 = sphi %s637_s10, %s817_s10   ;;  %s591_s9 = sphi %s635_s9, %s816_s9  }
   0x8   : > { %s61_s17 = sadd.s32 1, %s599_s11  ;;  %p68_p0 = scmp.ne.s32.totalorder %s599_s11, %s595_s10 }
   0x9   : > { %p69_p1 = scmp.eq.s32.totalorder %s611_s14, 0  ;;  %p74_p2 = scmp.ne.s32.totalorder %s595_s10, %s591_s9 }
   0xa   : > { %p673_p3 = scmp.eq.s32.totalorder %s363_s15, 0  ;;  %p100_p4 = scmp.eq.s32.totalorder %s363_s15, 1 }
   0xb   : > { %p677_p5 = por %p69_p1, %p68_p0  ;;  %p106_p6 = scmp.eq.s32.totalorder %s364_s16, 1 }
   0xc   : > { %p683_p7 = por %p673_p3, %p74_p2  ;;  %p687_p8 = por %p100_p4, %p68_p0 }
   0xd   : > { %p691_p9 = por %p106_p6, %p74_p2  ;;  %p365_p10 = scmp.ge.s32.totalorder %s611_s14, 1 }
   0xe   : > { %s806_s20 = scalar_select %p683_p7, 1, 0 }
   0xf   : > { %s807_s21 = scalar_select %p687_p8, 1, 0 }
  0x10   : > { %s808_s22 = scalar_select %p691_p9, 1, 0 }
  0x11   : > { %p113_p11 = scmp.lt.s32.totalorder %s611_s14, 3  ;;  %s613_s24 = smov [#allocation2]  }
  0x12   : > { %s126_s25 = sshll.u32 %s613_s24, 4  ;;  %p412_p1 = scmp.lt.s32.totalorder %s611_s14, 2  ;;  %s127_s25 = int_to_ptr.vmem [resolvable:$true] %s126_s25 }
  0x13   : > { %p698_p13 = pnand %p365_p10, %p113_p11  ;;  %s31_s28 = sadd.s32 1, %s607_s13 }
  0x14   : > { %p707_p4 = pnand %p412_p1, %p677_p5  ;;  %p33_p6 = scmp.ge.s32.totalorder %s31_s28, 2 }
  0x15   : > { %p399_p0 = pneg %p698_p13  ;;  %s137_s29 = sand.u32 1, %s599_s11  }
  0x16   : > { %s484_s30 = scalar_lea.vmem %s127_s25, 32  ;;  %p492_p8 = scmp.lt.s32.totalorder %s127_s25, %s127_s25 }
  0x17   : > { %p713_p2 = pnand %p399_p0, %p673_p3  ;;  %p485_p11 = scmp.ne.s32.totalorder %s127_s25, %s484_s30 }
  0x18   : > { %p493_p5 = scmp.lt.s32.totalorder %s484_s30, %s484_s30 }
  0x19   : > { %p475_p10 = pneg %p713_p2 }
  0x1a   : > { %p494_p1 = por %p493_p5, %p492_p8 }
  0x1b   : > { %p487_p12 = pnand %p485_p11, %p475_p10 }
  0x1d   : > { %p488_p9 = pneg %p487_p12 }
  0x1f   : > { %p495_p7 = pnand %p494_p1, %p488_p9 }
  0x21   : > { %498 = shalt.err (!%p495_p7)
}
  0x22   : > { %402 = dma.hbm_to_vmem [thread:$0]  (!%p713_p2), %s799_s0, 32, %s127_s25, [#allocation3]  }
  0x23   : > { %s822_s28 = smov (%p33_p6, %s31_s28), 0  ;;  %s368_s5 = sshll.u32 %s137_s29, 3 }
  0x24   : > { %s56_s6 = ssub.s32 %s607_s13, %s822_s28  ;;  %s382_s7 = sshll.u32 %s607_s13, 7 }
  0x25   : > { %p59_p12 = scmp.eq.s32.totalorder %s56_s6, 0  ;;  %s148_s16 = scalar_lea.hbm %s800_s1, %s382_s7 }
  0x26   : > { %s141_s19 = scalar_lea.vmem [#allocation5], %s368_s5  ;;  %s138_s30 = scalar_lea.sflag [#allocation6], %s137_s29 }
  0x27   : > { %s149_s24 = sshll.u32 %s141_s19, 4  ;;  %p501_p7 = pneg %p707_p4  ;;  %s150_s24 = int_to_ptr.vmem [resolvable:$true] %s149_s24 }
  0x28   : > { %s737_s27 = scalar_select %p59_p12, %s599_s11, %s61_s17  }
  0x29   : > { %s512_s25 = scalar_lea.vmem %s150_s24, 128  ;;  %s614_s3 = smov [#allocation5]  }
  0x2a   : > { %p513_p8 = scmp.ne.s32.totalorder %s150_s24, %s512_s25  ;;  %s517_s4 = sshll.u32 %s614_s3, 4  ;;  %s518_s4 = int_to_ptr.vmem [resolvable:$false] %s517_s4 }
  0x2b   : > { %s519_s6 = scalar_lea.vmem %s518_s4, 256  ;;  %p520_p2 = scmp.lt.s32.totalorder %s150_s24, %s518_s4 }
  0x2c   : > { %p515_p9 = pnand %p513_p8, %p501_p7  ;;  %p521_p6 = scmp.lt.s32.totalorder %s519_s6, %s512_s25 }
  0x2e   : > { %p516_p0 = pneg %p515_p9  ;;  %p522_p10 = por %p521_p6, %p520_p2 }
  0x30   : > { %p523_p11 = pnand %p522_p10, %p516_p0 }
  0x32   : > { %526 = shalt.err (!%p523_p11)
}
  0x33   : > { %s615_s5 = smov 64   ;;  %s616_s17 = smov 4  }
  0x34   : > { %406 = dma.hbm_to_vmem [thread:$0]  (!%p707_p4), %s148_s16, 128, %s150_s24, %s138_s30, %s615_s5, %s615_s5, %s616_s17  }
  0x35   : > { %161 = sbr.rel (%p698_p13) target bundleno = 308 (0x134), region = 28 }
  0x3a   : > { %578 = dma.done.wait (%p673_p3), [#allocation3], 32  }
  0x3b   : > { %580 = vsyncadd (%p673_p3), [#allocation3], 4294967264  ;;  %s750_s29 = sand.u32 1, %s595_s10   ;;  %p812_p5 = scmp.ne.s32.totalorder %s806_s20, 0 }
  0x3c   : > { %s373_s7 = sshll.u32 %s750_s29, 3  ;;  %s168_s8 = scalar_lea.sflag [#allocation6], %s750_s29 }
  0x3d   : > { %s171_s15 = scalar_lea.vmem [#allocation5], %s373_s7 }
  0x3e   : > { %582 = dma.done.wait (%p812_p5), %s168_s8, 128  }
  0x3f   : > { %584 = vsyncadd (%p812_p5), %s168_s8, 4294967168  ;;  %v617_v0 = vmov 0.0   ;;  %vm618_vm0 = vmmov 0   ;;  %v468_v1 = vld [vmem:[%s171_s15] sm:$0xff]   ;;  %v193_v2 = vld [vmem:[#allocation2] sm:$0x3] }
  0x40   : > { %385 = vmatprep.subr.bf16.mxu0 %v617_v0  ;;  %387 = vmatprep.mubr.msk.bf16.mxu0 %vm618_vm0, %v617_v0  ;;  %vm202_vm1 = vcmask 130048   ;;  %s374_s18 = sshll.u32 %s750_s29, 2  ;;  %s379_s20 = sshll.u32 %s603_s12, 6  ;;  %vm253_vm2 = vcmask 519168  }
  0x41   : > { %386 = vmatpush3.bf16.msra.mxu0 %v468_v1  ;;  %s191_s23 = scalar_lea.vmem [#allocation7], %s374_s18  ;;  %s268_s24 = scalar_lea.hbm %s801_s2, %s379_s20 }
  0x42   : > { %s270_s26 = sshll.u32 %s191_s23, 4  ;;  %s256_s30 = scalar_lea.sflag [#allocation4], %s750_s29  ;;  %s271_s26 = int_to_ptr.vmem [resolvable:$true] %s270_s26 }
  0x43   : > { %s527_s25 = scalar_lea.vmem %s271_s26, 64  ;;  %p813_p13 = scmp.ne.s32.totalorder %s807_s21, 0 }
  0x44   : > { %388 = vmatmul.mubr.msk.bf16.vlgmr.msra.gmra.mxu0 %vm202_vm1, %v193_v2  ;;  %p528_p3 = scmp.ne.s32.totalorder %s271_s26, %s527_s25  ;;  %s619_s3 = smov [#allocation7]  }
  0x45   : > { %s531_s4 = sshll.u32 %s619_s3, 4  ;;  %s532_s4 = int_to_ptr.vmem [resolvable:$false] %s531_s4 }
  0x46   : > { %p529_p4 = pnand %p528_p3, %p813_p13  ;;  %s533_s12 = scalar_lea.vmem %s532_s4, 128 }
  0x47   : > { %p534_p12 = scmp.lt.s32.totalorder %s271_s26, %s532_s4  ;;  %p535_p7 = scmp.lt.s32.totalorder %s533_s12, %s527_s25 }
  0x48   : > { %p530_p1 = pneg %p529_p4 }
  0x49   : > { %p536_p8 = por %p535_p7, %p534_p12 }
  0x4b   : > { %p537_p9 = pnand %p536_p8, %p530_p1 }
 0x104   : > { %v240_v3 = vpop.f32.mrf.mxu0 }
 0x105   : > { %v377_v4 = vmul.f32 -1.442695, %v240_v3 }
 0x106   : > { %v389_v5 = vpop.f32.mrf.mxu0 }
 0x107   : > { %469 = vpow2.f32 %v377_v4 }
 0x108   : > { %v243_v6 = vpop.f32.mrf.mxu0 }
 0x10a   : > { %v390_v7 = vpop.f32.mrf.mxu0 }
 0x114   : > { %v470_v8 = vpop.eup %469 }
 0x115   : > { %v249_v9 = vadd.f32 1.0, %v470_v8 }
 0x117   : > { %471 = vrcp.f32 %v249_v9 }
 0x124   : > { %v472_v10 = vpop.eup %471 }
 0x125   : > { %v252_v11 = vmul.f32 %v472_v10, %v240_v3 }
 0x127   : > { %254 = vst.msk [vmem:[%s191_s23] sm:$0xf] %vm253_vm2, %v252_v11 }
 0x128   : > { %540 = shalt.err (!%p537_p9)
}
 0x129   : > { %s541_s6 = scalar_lea.hbm %s268_s24, 64  ;;  %s545_s29 = scalar_lea.hbm %s801_s2, 128 }
 0x12a   : > { %p542_p0 = scmp.ne.s32.totalorder %s268_s24, %s541_s6  ;;  %p546_p10 = scmp.lt.s32.totalorder %s268_s24, %s801_s2 }
 0x12b   : > { %p547_p11 = scmp.lt.s32.totalorder %s545_s29, %s541_s6 }
 0x12c   : > { %p543_p2 = pnand %p542_p0, %p813_p13 }
 0x12d   : > { %p548_p5 = por %p547_p11, %p546_p10 }
 0x12e   : > { %p544_p6 = pneg %p543_p2 }
 0x130   : > { %p549_p3 = pnand %p548_p5, %p544_p6 }
 0x132   : > { %552 = shalt.err (!%p549_p3)
}
 0x133   : > { %397 = dma.vmem_to_hbm [thread:$0]  (%p813_p13), %s271_s26, 64, %s268_s24, %s256_s30  }
 0x134 PF: > { %s282_s15 = sand.u32 1, %s591_s9   ;;  %p814_p4 = scmp.ne.s32.totalorder %s808_s22, 0 }
 0x135   : > { %p815_p1 = scmp.ge.s32.totalorder %s611_s14, 2  ;;  %s283_s18 = scalar_lea.sflag [#allocation4], %s282_s15 }
 0x137   : > { %p408_p12 = pnand %p815_p1, %p814_p4 }
 0x139   : > { %p409_p7 = pneg %p408_p12 }
 0x13b   : > { %586 = dma.done.wait (%p409_p7), %s283_s18, 64  }
 0x13c   : > { %588 = vsyncadd (%p409_p7), %s283_s18, 4294967232  ;;  %s19_s14 = sadd.s32 1, %s611_s14   ;;  %s816_s9 = smov %s595_s10 }
 0x13d   : > { %p16_p8 = scmp.ge.s32.totalorder %s19_s14, 4   ;;  %s817_s10 = smov %s599_s11 }
 0x13e   : > { %s818_s11 = smov %s737_s27  ;;  %s819_s12 = smov %s607_s13 }
 0x13f   : > { %s820_s13 = smov %s822_s28  ;;  %18 = sbr.rel (!%p16_p8) target bundleno = 7 (0x7), region = 78 }
 0x144   :  { %288 = vsyncpa [#allocation3], 1 }
 0x145   :  { %290 = vsyncpa [#allocation3 + $0x1], 1 }
 0x146   :  { %291 = vsyncpa [#allocation6], 1 }
 0x147   :  { %293 = vsyncpa [#allocation6 + $0x1], 1 }
 0x148   :  { %294 = vsyncpa [#allocation4], 1 }
 0x149   :  { %296 = vsyncpa [#allocation4 + $0x1], 1 }

</bundles_post_ra>
